<compile_context>
chip_gen: v7x
topology: tpu7x:2x2x1
jax: 0.10.0
libtpu: 0.0.40
codegen_flags: <defaults>
</compile_context>

<pallas_src>
import jax
import jax.numpy as jnp
from jax.experimental import pallas as pl
from jax.experimental.pallas import tpu as pltpu


def _round_up(x: int, m: int) -> int:
    return ((x + m - 1) // m) * m


def _make_focal_kernel(alpha: float, gamma: float, n_valid: int, tile_n: int):
    """Returns the kernel body. alpha/gamma/n_valid/tile_n are baked-in constants."""

    def kernel(logits_ref, targets_ref, out_ref):
        i = pl.program_id(0)

        x = logits_ref[...].astype(jnp.float32)       # (TN, C)
        t = targets_ref[...]                          # (TN, 1) int32

        # Target-class logit via an iota/compare mask (no dynamic vreg gather
        # on TPU), gathered from the RAW logits so this cross-lane reduction is
        # independent of the max/subtract chain below and can overlap on XLU.
        col = jax.lax.broadcasted_iota(jnp.int32, x.shape, 1)
        tgt = jnp.sum(jnp.where(col == t, x, 0.0), axis=-1, keepdims=True)   # (TN, 1)

        # Numerically-stable logsumexp.
        m = jnp.max(x, axis=-1, keepdims=True)                               # (TN, 1)
        lse = m + jnp.log(jnp.sum(jnp.exp(x - m), axis=-1, keepdims=True))   # (TN, 1)

        # Per-row cross entropy and focal re-weighting.
        ce = lse - tgt                                # (TN, 1)
        pt = jnp.exp(-ce)
        w = jnp.maximum(1.0 - pt, 0.0)                # clamp: robust if pt rounds > 1

        g = float(gamma)
        if g == 0.0:
            wg = jnp.ones_like(w)
        elif g == 1.0:
            wg = w
        elif g == 2.0:                                # default: VPU multiply, no EUP pow
            wg = w * w
        elif g.is_integer() and 0.0 < g <= 8.0:
            wg = w
            for _ in range(int(g) - 1):
                wg = wg * w
        else:
            wg = w ** g

        focal = alpha * wg * ce                       # (TN, 1)

        # Mask rows belonging to the ragged tail of the last tile.  The block
        # may extend past N; out-of-bounds rows hold unspecified data, and any
        # NaN/Inf they produce is dropped by this select.
        row = jax.lax.broadcasted_iota(jnp.int32, focal.shape, 0) + i * tile_n
        focal = jnp.where(row < n_valid, focal, 0.0)

        # One f32 partial sum per tile, splatted into this tile's output block
        # ("parallel" grid semantics -> each step owns a disjoint block).
        out_ref[...] = jnp.broadcast_to(jnp.sum(focal), out_ref.shape)

    return kernel


def focal_loss(logits: jax.Array, targets: jax.Array,
               alpha: float = 1.0, gamma: float = 2.0,
               block_budget_bytes: int = 4 * 1024 * 1024,
               max_tile_rows: int | None = None) -> jax.Array:
    """Pallas focal loss. logits: (N, C) float, targets: (N,) int. Returns f32 scalar.

    Keep logits in their native dtype (e.g. bf16) -- do not upcast before
    calling; the kernel casts to f32 internally, halving HBM traffic.
    `max_tile_rows` is an optional cap on the row tile (mainly for tests).
    """
    n, c = logits.shape
    assert n >= 1 and c >= 1

    itemsize = jnp.dtype(logits.dtype).itemsize
    sublane = 8 * max(1, 4 // itemsize)          # 8 (32-bit) / 16 (bf16) / 32 (8-bit)

    # Rows per tile from a VMEM budget on the f32 working set (intermediates
    # are f32 regardless of input dtype); VMEM layout pads C to 128 lanes.
    c_lanes = _round_up(c, 128)
    tn = max(sublane, (block_budget_bytes // 4 // c_lanes) // sublane * sublane)
    tn = min(tn, _round_up(n, sublane))
    if max_tile_rows is not None:
        tn = min(tn, max(sublane, _round_up(max_tile_rows, sublane)))
    num_tiles = -(-n // tn)

    targets2d = targets.astype(jnp.int32).reshape(n, 1)

    partials = pl.pallas_call(
        _make_focal_kernel(float(alpha), float(gamma), n, tn),
        out_shape=jax.ShapeDtypeStruct((num_tiles, 8, 128), jnp.float32),
        grid_spec=pltpu.PrefetchScalarGridSpec(
            num_scalar_prefetch=0,
            grid=(num_tiles,),
            in_specs=[
                pl.BlockSpec((tn, c), lambda i: (i, 0)),   # logits tile (full C)
                pl.BlockSpec((tn, 1), lambda i: (i, 0)),   # targets column
            ],
            out_specs=pl.BlockSpec((1, 8, 128), lambda i: (i, 0, 0)),  # per-tile partial
        ),
        compiler_params=pltpu.CompilerParams(
            dimension_semantics=("parallel",),             # both TCs stream on v7x
            vmem_limit_bytes=32 * 1024 * 1024,
        ),
    )(logits, targets2d)

    # Tiny wrapper-side finish: sum per-tile partials (num_tiles elements) / N.
    return jnp.sum(partials[:, 0, 0]) / n


def _focal_loss_ref(logits, targets, alpha=1.0, gamma=2.0):
    """Pure-JAX reference matching torch.nn.functional.cross_entropy semantics."""
    logp = jax.nn.log_softmax(logits.astype(jnp.float32), axis=-1)
    ce = -jnp.take_along_axis(logp, targets[:, None].astype(jnp.int32), axis=-1)[:, 0]
    pt = jnp.exp(-ce)
    return jnp.mean(alpha * (1.0 - pt) ** gamma * ce)


if __name__ == "__main__":
    key = jax.random.PRNGKey(0)
    k1, k2, k3, k4, k5, k6 = jax.random.split(key, 6)

    # Case 1: the module's toy shapes (batch=8, num_classes=32), f32.
    N, C = 8, 32
    logits = jax.random.normal(k1, (N, C), dtype=jnp.float32)
    targets = jax.random.randint(k2, (N,), 0, C, dtype=jnp.int32)
    loss = focal_loss(logits, targets, alpha=1.0, gamma=2.0)
    jax.block_until_ready(loss)
    ref = _focal_loss_ref(logits, targets, alpha=1.0, gamma=2.0)
    assert jnp.allclose(loss, ref, atol=1e-5, rtol=1e-5), (loss, ref)

    # Case 2: ragged N (not a multiple of the tile), non-128-aligned C,
    # multi-step grid -> exercises the row mask and the full-C block path.
    N2, C2 = 13, 40
    logits2 = jax.random.normal(k3, (N2, C2), dtype=jnp.float32)
    targets2 = jax.random.randint(k4, (N2,), 0, C2, dtype=jnp.int32)
    loss2 = focal_loss(logits2, targets2, alpha=0.5, gamma=2.0, max_tile_rows=8)
    jax.block_until_ready(loss2)
    ref2 = _focal_loss_ref(logits2, targets2, alpha=0.5, gamma=2.0)
    assert jnp.allclose(loss2, ref2, atol=1e-5, rtol=1e-5), (loss2, ref2)

    # Case 3: bf16 logits (native-dtype HBM stream, f32 math in-kernel),
    # bf16 sublane packing (16-row tiles), multi-tile grid.
    N3, C3 = 64, 48
    logits3 = jax.random.normal(k5, (N3, C3), jnp.float32).astype(jnp.bfloat16)
    targets3 = jax.random.randint(k6, (N3,), 0, C3, dtype=jnp.int32)
    loss3 = focal_loss(logits3, targets3, alpha=1.0, gamma=2.0, max_tile_rows=16)
    jax.block_until_ready(loss3)
    ref3 = _focal_loss_ref(logits3, targets3, alpha=1.0, gamma=2.0)
    assert jnp.allclose(loss3, ref3, atol=1e-4, rtol=1e-4), (loss3, ref3)

    print("KERNEL_OK")
</pallas_src>

<mosaic_0001>
module attributes {stable_mosaic.version = 11 : i64} {
  func.func @kernel(%arg0: i32, %arg1: memref<8x32xf32, #tpu.memory_space<vmem>>, %arg2: memref<8x1xi32, #tpu.memory_space<vmem>>, %arg3: memref<1x8x128xf32, #tpu.memory_space<vmem>>) attributes {dimension_semantics = [#tpu.dimension_semantics<parallel>], iteration_bounds = array<i64: 1>, scalar_prefetch = 0 : i64, scratch_operands = 0 : i64, tpu.core_type = #tpu.core_type<tc>, window_params = [{transform_indices = @transform_0, window_bounds = array<i64: 8, 32>}, {transform_indices = @transform_1, window_bounds = array<i64: 8, 1>}, {transform_indices = @transform_2, window_bounds = array<i64: 1, 8, 128>}]} {
    %c0 = arith.constant 0 : index
    %c0_0 = arith.constant 0 : index
    %0 = vector.load %arg1[%c0, %c0_0] : memref<8x32xf32, #tpu.memory_space<vmem>>, vector<8x32xf32>
    %c0_1 = arith.constant 0 : index
    %c0_2 = arith.constant 0 : index
    %1 = vector.load %arg2[%c0_1, %c0_2] : memref<8x1xi32, #tpu.memory_space<vmem>>, vector<8x1xi32>
    %2 = tpu.iota {dimensions = array<i32: 1>} : vector<8x32xi32>
    %3 = vector.broadcast %1 : vector<8x1xi32> to vector<8x32xi32>
    %4 = arith.cmpi eq, %2, %3 : vector<8x32xi32>
    %cst = arith.constant 0.000000e+00 : f32
    %5 = vector.broadcast %cst : f32 to vector<8x32xf32>
    %6 = arith.select %4, %0, %5 : vector<8x32xi1>, vector<8x32xf32>
    %cst_3 = arith.constant dense<0.000000e+00> : vector<8xf32>
    %7 = vector.multi_reduction <add>, %6, %cst_3 [1] : vector<8x32xf32> to vector<8xf32>
    %8 = vector.shape_cast %7 : vector<8xf32> to vector<8x1xf32>
    %cst_4 = arith.constant dense<0xFF800000> : vector<8xf32>
    %9 = vector.multi_reduction <maximumf>, %0, %cst_4 [1] : vector<8x32xf32> to vector<8xf32>
    %10 = vector.shape_cast %9 : vector<8xf32> to vector<8x1xf32>
    %11 = vector.broadcast %10 : vector<8x1xf32> to vector<8x32xf32>
    %12 = arith.subf %0, %11 : vector<8x32xf32>
    %13 = math.exp %12 : vector<8x32xf32>
    %cst_5 = arith.constant dense<0.000000e+00> : vector<8xf32>
    %14 = vector.multi_reduction <add>, %13, %cst_5 [1] : vector<8x32xf32> to vector<8xf32>
    %15 = vector.shape_cast %14 : vector<8xf32> to vector<8x1xf32>
    %16 = math.log %15 : vector<8x1xf32>
    %17 = arith.addf %10, %16 : vector<8x1xf32>
    %18 = arith.subf %17, %8 : vector<8x1xf32>
    %cst_6 = arith.constant 0.000000e+00 : f32
    %19 = vector.broadcast %cst_6 : f32 to vector<8x1xf32>
    %20 = arith.subf %19, %18 : vector<8x1xf32>
    %21 = math.exp %20 : vector<8x1xf32>
    %cst_7 = arith.constant 1.000000e+00 : f32
    %22 = vector.broadcast %cst_7 : f32 to vector<8x1xf32>
    %23 = arith.subf %22, %21 : vector<8x1xf32>
    %cst_8 = arith.constant 0.000000e+00 : f32
    %24 = vector.broadcast %cst_8 : f32 to vector<8x1xf32>
    %25 = arith.maximumf %23, %24 : vector<8x1xf32>
    %26 = arith.mulf %25, %25 : vector<8x1xf32>
    %cst_9 = arith.constant 1.000000e+00 : f32
    %27 = vector.broadcast %cst_9 : f32 to vector<8x1xf32>
    %28 = arith.mulf %27, %26 : vector<8x1xf32>
    %29 = arith.mulf %28, %18 : vector<8x1xf32>
    %30 = tpu.iota {dimensions = array<i32: 0>} : vector<8x1xi32>
    %c8_i32 = arith.constant 8 : i32
    %31 = arith.muli %arg0, %c8_i32 : i32
    %32 = vector.broadcast %31 : i32 to vector<8x1xi32>
    %33 = arith.addi %30, %32 : vector<8x1xi32>
    %c8_i32_10 = arith.constant 8 : i32
    %34 = vector.broadcast %c8_i32_10 : i32 to vector<8x1xi32>
    %35 = arith.cmpi slt, %33, %34 : vector<8x1xi32>
    %cst_11 = arith.constant 0.000000e+00 : f32
    %36 = vector.broadcast %cst_11 : f32 to vector<8x1xf32>
    %37 = arith.select %35, %29, %36 : vector<8x1xi1>, vector<8x1xf32>
    %38 = vector.shape_cast %37 : vector<8x1xf32> to vector<1x8x1xf32>
    %cst_12 = arith.constant dense<0.000000e+00> : vector<1xf32>
    %39 = vector.multi_reduction <add>, %38, %cst_12 [1, 2] : vector<1x8x1xf32> to vector<1xf32>
    %40 = vector.shape_cast %39 : vector<1xf32> to vector<1x1x1xf32>
    %41 = vector.extract %40[0, 0, 0] : f32 from vector<1x1x1xf32>
    %42 = vector.broadcast %41 : f32 to vector<1x8x128xf32>
    %c0_13 = arith.constant 0 : index
    %c0_14 = arith.constant 0 : index
    %c0_15 = arith.constant 0 : index
    %43 = vector.load %arg3[%c0_13, %c0_14, %c0_15] : memref<1x8x128xf32, #tpu.memory_space<vmem>>, vector<1x8x128xf32>
    tpu.vector_store %arg3[%c0_13, %c0_14, %c0_15], %42 {strides = array<i32>} : memref<1x8x128xf32, #tpu.memory_space<vmem>>, vector<1x8x128xf32>,
    return
  }
  func.func @transform_0(%arg0: i32) -> (i32, i32) {
    %c0_i32 = arith.constant 0 : i32
    %c0_i32_0 = arith.constant 0 : i32
    return %arg0, %c0_i32 : i32, i32
  }
  func.func @transform_1(%arg0: i32) -> (i32, i32) {
    %c0_i32 = arith.constant 0 : i32
    %c0_i32_0 = arith.constant 0 : i32
    return %arg0, %c0_i32 : i32, i32
  }
  func.func @transform_2(%arg0: i32) -> (i32, i32, i32) {
    %c0_i32 = arith.constant 0 : i32
    %c0_i32_0 = arith.constant 0 : i32
    %c0_i32_1 = arith.constant 0 : i32
    return %arg0, %c0_i32, %c0_i32_0 : i32, i32, i32
  }
}

</mosaic_0001>

<bundles_post_ra>
// kernel: tpu_custom_call.1
= control target key start
LH: loop header
LB: loop body
LE: loop exit
PB: predicated region body
PF: predicated region fallthrough
CT: control target
= control target key end

     0   :  { %vm21_vm0 = vcmask 261120   ;;  %s152_s0 = inlined_call_operand.vmem [shape: f32[8,32], index: 0, kind: input, shape index: {}]   ;;  %s153_s1 = inlined_call_operand.vmem [shape: s32[8,1], index: 1, kind: input, shape index: {}]   ;;  %s154_s2 = inlined_call_operand.hbm [shape: f32[1,8,128], index: 2, kind: output, shape index: {}]  }
   0x1   :  { %v12_v0 = vld [vmem:[%s152_s0] sm:$0xff] }
   0x2   :  { %7 = vsyncpa [#allocation3], 0  ;;  %v25_v1 = vsel %vm21_vm0, %v12_v0, -inf  ;;  %v114_v2 = vmov 0   ;;  %v13_v3 = vld [vmem:[%s153_s1] sm:$0xff]  ;;  %v14_v7 = vlaneseq  ;;  %vm52_vm2 = vcmask 7168  }
   0x3   :  { %83 = vset.pattern.permute.xlu0 %v114_v2  ;;  %s115_s0 = smov [#allocation2]  }
   0x4   :  { %26 = vmax.xlane.f32.xlu0 %v25_v1  ;;  %v15_v8 = vand.u32 127, %v14_v7  ;;  %s71_s1 = sshll.u32 %s115_s0, 4  ;;  %s72_s1 = int_to_ptr.vmem [resolvable:$true] %s71_s1 }
   0x5   :  { %s90_s14 = scalar_lea.vmem %s72_s1, 128  ;;  %p95_p1 = scmp.lt.s32.totalorder %s72_s1, %s72_s1 }
   0x6   :  { %p91_p0 = scmp.ne.s32.totalorder %s72_s1, %s90_s14  ;;  %p96_p2 = scmp.lt.s32.totalorder %s90_s14, %s90_s14 }
   0x8   :  { %p97_p3 = por %p96_p2, %p95_p1 }
   0xa   :  { %p98_p4 = pnand %p97_p3, %p91_p0 }
  0x1a   :  { %17 = vperm.xlu0 %83, %v13_v3  }
  0x91   :  { %v27_v4 = vpop.xlane.xlu0 %26 }
  0x92   :  { %v28_v5 = vsub.f32 %v12_v0, %v27_v4 }
  0x94   :  { %v29_v6 = vmul.f32 1.442695, %v28_v5 }
  0x96   :  { %84 = vpow2.f32 %v29_v6 }
  0x99   :  { %v18_v9 = vpop.permute.xlu0 %17 }
  0x9a   :  { %vm19_vm1 = vcmp.eq.s32.totalorder %v15_v8, %v18_v9 }
  0x9b   :  { %v20_v11 = vsel %vm19_vm1, %v12_v0, 0.0 }
  0x9c   :  { %v22_v13 = vsel %vm21_vm0, %v20_v11, 0.0 }
  0xa0   :  { %v85_v10 = vpop.eup %84 }
  0xa1   :  { %v31_v12 = vsel %vm21_vm0, %v85_v10, 0.0 }
  0xa2   :  { %32 = vadd.xlane.f32.xlu1 %v31_v12 }
  0xa6   :  { %23 = vadd.xlane.f32.xlu1 %v22_v13 }
 0x12f   :  { %v33_v14 = vpop.xlane.xlu1 %32 }
 0x130   :  { %86 = vlog2.f32 %v33_v14 }
 0x133   :  { %v24_v17 = vpop.xlane.xlu1 %23 }
 0x13a   :  { %v87_v15 = vpop.eup %86 }
 0x13b   :  { %v35_v16 = vmul.f32 0.6931472, %v87_v15 }
 0x13d   :  { %v36_v18 = vadd.f32 %v35_v16, %v27_v4 }
 0x13f   :  { %v37_v19 = vsub.f32 %v36_v18, %v24_v17 }
 0x141   :  { %v38_v20 = vsub.f32 0.0, %v37_v19 }
 0x143   :  { %v39_v21 = vmul.f32 1.442695, %v38_v20 }
 0x145   :  { %88 = vpow2.f32 %v39_v21 }
 0x14f   :  { %v89_v22 = vpop.eup %88 }
 0x150   :  { %v41_v23 = vsub.f32 1.0, %v89_v22 }
 0x152   :  { %v42_v24 = vmax.f32 %v41_v23, 0.0 }
 0x154   :  { %v43_v25 = vmul.f32 %v42_v24, %v42_v24 }
 0x156   :  { %v44_v26 = vmul.f32 %v43_v25, %v37_v19 }
 0x158   :  { %v53_v27 = vsel %vm52_vm2, %v44_v26, 0.0 }
 0x159   :  { %54 = vadd.xlane.f32.xlu1 %v53_v27 }
 0x1e6   :  { %v55_v28 = vpop.xlane.xlu1 %54 }
 0x1e7   :  { %v56_v29 = vrot.slane %v55_v28, 4 }
 0x1e9   :  { %v57_v30 = vadd.f32 %v56_v29, %v55_v28 }
 0x1eb   :  { %v58_v31 = vrot.slane %v57_v30, 2 }
 0x1ed   :  { %v59_v32 = vadd.f32 %v58_v31, %v57_v30 }
 0x1ef   :  { %v60_v33 = vrot.slane %v59_v32, 1 }
 0x1f1   :  { %v61_v34 = vadd.f32 %v60_v33, %v59_v32 }
 0x1f3   :  { %79 = vpush %v61_v34 }
 0x224   :  { %s80_s13 = spop %79 }
 0x225   :  { %v63_v35 = vstv %s80_s13 }
 0x226   :  { %64 = vst [vmem:[#allocation2] sm:$0xff] %v63_v35 }
 0x227   :  { %101 = shalt.err (!%p98_p4)
}
 0x228   :  { %s102_s17 = scalar_lea.hbm %s154_s2, 128 }
 0x229   :  { %p103_p5 = scmp.ne.s32.totalorder %s154_s2, %s102_s17  ;;  %p106_p6 = scmp.lt.u32.totalorder %s102_s17, %s154_s2 }
 0x22b   :  { %p108_p7 = pnand %p106_p6, %p103_p5 }
 0x22d   :  { %111 = shalt.err (!%p108_p7)
}
 0x22e   :  { %74 = dma.vmem_to_hbm [thread:$0]  %s72_s1, 128, %s154_s2, [#allocation3]  }
 0x22f   :  { %112 = dma.done.wait [#allocation3], 128  }
 0x230   :  { %113 = vsyncadd [#allocation3], 4294967168 }
 0x231   :  { %78 = vsyncpa [#allocation3], 1 }

</bundles_post_ra>
